<compile_context>
chip_gen: v5e
topology: v5e:2x2
jax: 0.10.0
libtpu: 0.0.40
codegen_flags: <defaults>
</compile_context>

<pallas_src>
import jax
import jax.numpy as jnp
from jax.experimental import pallas as pl
from jax.experimental.pallas import tpu as pltpu


class Vocabulary:
    """Container of action-ids (mirrors the PyTorch helper)."""

    def __init__(self, actions):
        self.actions = actions
        self.action_dict = {a: i for i, a in enumerate(actions)}

    def __len__(self):
        return len(self.actions)


def _round_up(x: int, m: int) -> int:
    return ((x + m - 1) // m) * m


def _tensorcores_per_chip() -> int:
    """Best-effort: v7x has 2 TensorCores per chip; v5e/v6e have 1."""
    try:
        kind = jax.devices()[0].device_kind.lower()
    except Exception:
        return 1
    return 2 if "v7" in kind else 1


_SMALL_VOCAB_MAX = 128   # below this the VPU select path beats the MXU path


def _embed_select_kernel(ids_ref, table_ref, out_ref):
    """Tiny-vocab path: V-way VPU select-accumulate (exact f32, no MXU).

    ids_ref:   (RT, 1) int32  -- sublane-major ids for this row tile
    table_ref: (V, D)         -- full table, single-buffered in VMEM
    out_ref:   (RT, D)        -- lane-dense output slab
    """
    ids = ids_ref[...]                                    # (RT, 1)
    tab = table_ref[...].astype(jnp.float32)              # (V, D), one load
    acc = jnp.zeros(out_ref.shape, jnp.float32)
    v_total = tab.shape[0]
    for v in range(v_total):                              # static unroll, V tiny
        hit = (ids == v).astype(jnp.float32)              # (RT, 1) lane-broadcast
        acc = acc + hit * tab[v][None, :]                 # exact: one hit per row
    out_ref[...] = acc.astype(out_ref.dtype)


def _embed_matmul_kernel(ids_ref, table_ref, out_ref):
    """Gather-as-matmul path for larger vocabularies (MXU one-hot lookup)."""
    ids = ids_ref[...]                                    # (RT, 1) sublane-major
    rt = ids.shape[0]
    v_total = table_ref.shape[0]
    iota_v = jax.lax.broadcasted_iota(jnp.int32, (rt, v_total), 1)
    onehot = (ids == iota_v).astype(table_ref.dtype)      # (RT, V), lane-broadcast
    precision = (jax.lax.Precision.HIGHEST
                 if table_ref.dtype == jnp.float32 else None)
    emb = jnp.dot(onehot, table_ref[...],
                  preferred_element_type=jnp.float32,
                  precision=precision)                    # (RT, D)
    out_ref[...] = emb.astype(out_ref.dtype)


def sequence_embedding(x_ids: jax.Array, table: jax.Array) -> jax.Array:
    """x_ids: (B, L) int; table: (V, D) -> (B, L, D) in table dtype."""
    B, L = x_ids.shape
    V, D = table.shape
    R = B * L

    # --- tiling ------------------------------------------------------------
    # One fat row tile per TensorCore.  No forced 2-way split on 1-TC chips
    # (v5e/v6e): at small R the ~0.35us/step grid overhead dominates.
    n_tc = _tensorcores_per_chip()
    cap = 512 if V <= 2048 else 256
    row_tile = max(8, min(cap, _round_up(pl.cdiv(R, n_tc), 8)))
    R_pad = _round_up(R, row_tile)
    num_tiles = R_pad // row_tile

    # Sublane-major ids column (avoids an XLU relayout of a lane-row of ids).
    ids_col = x_ids.reshape(R, 1).astype(jnp.int32)
    if R_pad != R:
        # Padding rows use id 0 (in-range); their outputs are sliced off below.
        ids_col = jnp.pad(ids_col, ((0, R_pad - R), (0, 0)))

    kernel = _embed_select_kernel if V <= _SMALL_VOCAB_MAX else _embed_matmul_kernel

    # --- VMEM budget (sized for v7x: 64 MiB physical / 32 MiB default scoped)
    itemsize = jnp.dtype(table.dtype).itemsize
    table_bytes = V * D * itemsize                                  # Buffered(1)
    io_bytes = 2 * (row_tile * 4 + row_tile * D * itemsize)         # dbl-buffered tiles
    live_bytes = row_tile * max(V, 128) * 4                         # one-hot / temps
    vmem_limit = int(min(64 << 20,
                         max(16 << 20,
                             table_bytes + io_bytes + live_bytes + (4 << 20))))

    cost = pl.CostEstimate(
        flops=2 * R_pad * V * D,
        transcendentals=0,
        bytes_accessed=R_pad * 4 + V * D * itemsize + R_pad * D * itemsize,
    )

    out_flat = pl.pallas_call(
        kernel,
        out_shape=jax.ShapeDtypeStruct((R_pad, D), table.dtype),
        grid_spec=pltpu.PrefetchScalarGridSpec(
            num_scalar_prefetch=0,
            grid=(num_tiles,),
            in_specs=[
                # Sublane-major ids column for this row tile.
                pl.BlockSpec((row_tile, 1), lambda r: (r, 0)),
                # Full table, constant index_map -> single-buffered (halves
                # table VMEM residency vs the default 2 buffers).
                pl.BlockSpec((V, D), lambda r: (0, 0),
                             pipeline_mode=pl.Buffered(1)),
            ],
            # Lane-dense 2-D output slab; reshaped to (B, L, D) in the wrapper.
            out_specs=pl.BlockSpec((row_tile, D), lambda r: (r, 0)),
        ),
        compiler_params=pltpu.CompilerParams(
            dimension_semantics=("parallel",),
            vmem_limit_bytes=vmem_limit),
        cost_estimate=cost,
    )(ids_col, table)

    return out_flat[:R].reshape(B, L, D)


def make_embedding_table(vocab: Vocabulary, embedding_dim: int,
                         key: jax.Array) -> jax.Array:
    """Stand-in for nn.Embedding weights with the padding_idx row zeroed."""
    V = len(vocab)
    table = jax.random.normal(key, (V, embedding_dim), dtype=jnp.float32)
    pad_id = vocab.action_dict['[PAD]']
    table = table.at[pad_id].set(0.0)   # padding_idx semantics
    return table


if __name__ == "__main__":
    key = jax.random.PRNGKey(0)

    # Small synthetic vocabulary: 2 special tokens + 14 actions -> V = 16.
    actions = ['[PAD]', '[SOS]'] + [f'act_{i}' for i in range(14)]
    vocab = Vocabulary(actions)
    embedding_dim = 128          # lane-dense output (multiple of 128)
    batch, max_len = 2, 8

    k_tab, k_ids = jax.random.split(key)
    table = make_embedding_table(vocab, embedding_dim, k_tab)

    # Random ids with trailing [PAD] positions like a padded batch.
    ids = jax.random.randint(k_ids, (batch, max_len), minval=0,
                             maxval=len(vocab), dtype=jnp.int32)
    pad_id = vocab.action_dict['[PAD]']
    ids = ids.at[0, -2:].set(pad_id)
    ids = ids.at[1, -3:].set(pad_id)

    out = sequence_embedding(ids, table)
    out = jax.block_until_ready(out)

    # Reference check (plain JAX gather == nn.Embedding forward).
    ref = jnp.take(table, ids, axis=0)
    assert out.shape == (batch, max_len, embedding_dim)
    assert jnp.allclose(out, ref, atol=1e-5), "mismatch vs reference gather"
    assert jnp.all(out[0, -2:] == 0.0), "pad rows must embed to zeros"

    print("KERNEL_OK")
</pallas_src>

<mosaic_0001>
module attributes {stable_mosaic.version = 11 : i64} {
  func.func @_embed_select_kernel(%arg0: i32, %arg1: memref<16x1xi32, #tpu.memory_space<vmem>>, %arg2: memref<16x128xf32, #tpu.memory_space<vmem>>, %arg3: memref<16x128xf32, #tpu.memory_space<vmem>>) attributes {dimension_semantics = [#tpu.dimension_semantics<parallel>], iteration_bounds = array<i64: 1>, scalar_prefetch = 0 : i64, scratch_operands = 0 : i64, tpu.core_type = #tpu.core_type<tc>, window_params = [{transform_indices = @transform_0, window_bounds = array<i64: 16, 1>}, {pipeline_mode = #tpu.pipeline_mode<synchronous>, transform_indices = @transform_1, window_bounds = array<i64: 16, 128>}, {transform_indices = @transform_2, window_bounds = array<i64: 16, 128>}]} {
    %c0 = arith.constant 0 : index
    %c0_0 = arith.constant 0 : index
    %0 = vector.load %arg1[%c0, %c0_0] : memref<16x1xi32, #tpu.memory_space<vmem>>, vector<16x1xi32>
    %c0_1 = arith.constant 0 : index
    %c0_2 = arith.constant 0 : index
    %1 = vector.load %arg2[%c0_1, %c0_2] : memref<16x128xf32, #tpu.memory_space<vmem>>, vector<16x128xf32>
    %cst = arith.constant 0.000000e+00 : f32
    %2 = vector.broadcast %cst : f32 to vector<16x128xf32>
    %c0_i32 = arith.constant 0 : i32
    %3 = vector.broadcast %c0_i32 : i32 to vector<16x1xi32>
    %4 = arith.cmpi eq, %0, %3 : vector<16x1xi32>
    %5 = arith.extui %4 : vector<16x1xi1> to vector<16x1xi32>
    %6 = arith.sitofp %5 : vector<16x1xi32> to vector<16x1xf32>
    %7 = vector.extract_strided_slice %1 {offsets = [0, 0], sizes = [1, 128], strides = [1, 1]} : vector<16x128xf32> to vector<1x128xf32>
    %8 = vector.shape_cast %7 : vector<1x128xf32> to vector<128xf32>
    %9 = vector.shape_cast %8 : vector<128xf32> to vector<1x128xf32>
    %10 = vector.broadcast %6 : vector<16x1xf32> to vector<16x128xf32>
    %11 = vector.broadcast %9 : vector<1x128xf32> to vector<16x128xf32>
    %12 = arith.mulf %10, %11 : vector<16x128xf32>
    %13 = arith.addf %2, %12 : vector<16x128xf32>
    %c1_i32 = arith.constant 1 : i32
    %14 = vector.broadcast %c1_i32 : i32 to vector<16x1xi32>
    %15 = arith.cmpi eq, %0, %14 : vector<16x1xi32>
    %16 = arith.extui %15 : vector<16x1xi1> to vector<16x1xi32>
    %17 = arith.sitofp %16 : vector<16x1xi32> to vector<16x1xf32>
    %18 = vector.extract_strided_slice %1 {offsets = [1, 0], sizes = [1, 128], strides = [1, 1]} : vector<16x128xf32> to vector<1x128xf32>
    %19 = vector.shape_cast %18 : vector<1x128xf32> to vector<128xf32>
    %20 = vector.shape_cast %19 : vector<128xf32> to vector<1x128xf32>
    %21 = vector.broadcast %17 : vector<16x1xf32> to vector<16x128xf32>
    %22 = vector.broadcast %20 : vector<1x128xf32> to vector<16x128xf32>
    %23 = arith.mulf %21, %22 : vector<16x128xf32>
    %24 = arith.addf %13, %23 : vector<16x128xf32>
    %c2_i32 = arith.constant 2 : i32
    %25 = vector.broadcast %c2_i32 : i32 to vector<16x1xi32>
    %26 = arith.cmpi eq, %0, %25 : vector<16x1xi32>
    %27 = arith.extui %26 : vector<16x1xi1> to vector<16x1xi32>
    %28 = arith.sitofp %27 : vector<16x1xi32> to vector<16x1xf32>
    %29 = vector.extract_strided_slice %1 {offsets = [2, 0], sizes = [1, 128], strides = [1, 1]} : vector<16x128xf32> to vector<1x128xf32>
    %30 = vector.shape_cast %29 : vector<1x128xf32> to vector<128xf32>
    %31 = vector.shape_cast %30 : vector<128xf32> to vector<1x128xf32>
    %32 = vector.broadcast %28 : vector<16x1xf32> to vector<16x128xf32>
    %33 = vector.broadcast %31 : vector<1x128xf32> to vector<16x128xf32>
    %34 = arith.mulf %32, %33 : vector<16x128xf32>
    %35 = arith.addf %24, %34 : vector<16x128xf32>
    %c3_i32 = arith.constant 3 : i32
    %36 = vector.broadcast %c3_i32 : i32 to vector<16x1xi32>
    %37 = arith.cmpi eq, %0, %36 : vector<16x1xi32>
    %38 = arith.extui %37 : vector<16x1xi1> to vector<16x1xi32>
    %39 = arith.sitofp %38 : vector<16x1xi32> to vector<16x1xf32>
    %40 = vector.extract_strided_slice %1 {offsets = [3, 0], sizes = [1, 128], strides = [1, 1]} : vector<16x128xf32> to vector<1x128xf32>
    %41 = vector.shape_cast %40 : vector<1x128xf32> to vector<128xf32>
    %42 = vector.shape_cast %41 : vector<128xf32> to vector<1x128xf32>
    %43 = vector.broadcast %39 : vector<16x1xf32> to vector<16x128xf32>
    %44 = vector.broadcast %42 : vector<1x128xf32> to vector<16x128xf32>
    %45 = arith.mulf %43, %44 : vector<16x128xf32>
    %46 = arith.addf %35, %45 : vector<16x128xf32>
    %c4_i32 = arith.constant 4 : i32
    %47 = vector.broadcast %c4_i32 : i32 to vector<16x1xi32>
    %48 = arith.cmpi eq, %0, %47 : vector<16x1xi32>
    %49 = arith.extui %48 : vector<16x1xi1> to vector<16x1xi32>
    %50 = arith.sitofp %49 : vector<16x1xi32> to vector<16x1xf32>
    %51 = vector.extract_strided_slice %1 {offsets = [4, 0], sizes = [1, 128], strides = [1, 1]} : vector<16x128xf32> to vector<1x128xf32>
    %52 = vector.shape_cast %51 : vector<1x128xf32> to vector<128xf32>
    %53 = vector.shape_cast %52 : vector<128xf32> to vector<1x128xf32>
    %54 = vector.broadcast %50 : vector<16x1xf32> to vector<16x128xf32>
    %55 = vector.broadcast %53 : vector<1x128xf32> to vector<16x128xf32>
    %56 = arith.mulf %54, %55 : vector<16x128xf32>
    %57 = arith.addf %46, %56 : vector<16x128xf32>
    %c5_i32 = arith.constant 5 : i32
    %58 = vector.broadcast %c5_i32 : i32 to vector<16x1xi32>
    %59 = arith.cmpi eq, %0, %58 : vector<16x1xi32>
    %60 = arith.extui %59 : vector<16x1xi1> to vector<16x1xi32>
    %61 = arith.sitofp %60 : vector<16x1xi32> to vector<16x1xf32>
    %62 = vector.extract_strided_slice %1 {offsets = [5, 0], sizes = [1, 128], strides = [1, 1]} : vector<16x128xf32> to vector<1x128xf32>
    %63 = vector.shape_cast %62 : vector<1x128xf32> to vector<128xf32>
    %64 = vector.shape_cast %63 : vector<128xf32> to vector<1x128xf32>
    %65 = vector.broadcast %61 : vector<16x1xf32> to vector<16x128xf32>
    %66 = vector.broadcast %64 : vector<1x128xf32> to vector<16x128xf32>
    %67 = arith.mulf %65, %66 : vector<16x128xf32>
    %68 = arith.addf %57, %67 : vector<16x128xf32>
    %c6_i32 = arith.constant 6 : i32
    %69 = vector.broadcast %c6_i32 : i32 to vector<16x1xi32>
    %70 = arith.cmpi eq, %0, %69 : vector<16x1xi32>
    %71 = arith.extui %70 : vector<16x1xi1> to vector<16x1xi32>
    %72 = arith.sitofp %71 : vector<16x1xi32> to vector<16x1xf32>
    %73 = vector.extract_strided_slice %1 {offsets = [6, 0], sizes = [1, 128], strides = [1, 1]} : vector<16x128xf32> to vector<1x128xf32>
    %74 = vector.shape_cast %73 : vector<1x128xf32> to vector<128xf32>
    %75 = vector.shape_cast %74 : vector<128xf32> to vector<1x128xf32>
    %76 = vector.broadcast %72 : vector<16x1xf32> to vector<16x128xf32>
    %77 = vector.broadcast %75 : vector<1x128xf32> to vector<16x128xf32>
    %78 = arith.mulf %76, %77 : vector<16x128xf32>
    %79 = arith.addf %68, %78 : vector<16x128xf32>
    %c7_i32 = arith.constant 7 : i32
    %80 = vector.broadcast %c7_i32 : i32 to vector<16x1xi32>
    %81 = arith.cmpi eq, %0, %80 : vector<16x1xi32>
    %82 = arith.extui %81 : vector<16x1xi1> to vector<16x1xi32>
    %83 = arith.sitofp %82 : vector<16x1xi32> to vector<16x1xf32>
    %84 = vector.extract_strided_slice %1 {offsets = [7, 0], sizes = [1, 128], strides = [1, 1]} : vector<16x128xf32> to vector<1x128xf32>
    %85 = vector.shape_cast %84 : vector<1x128xf32> to vector<128xf32>
    %86 = vector.shape_cast %85 : vector<128xf32> to vector<1x128xf32>
    %87 = vector.broadcast %83 : vector<16x1xf32> to vector<16x128xf32>
    %88 = vector.broadcast %86 : vector<1x128xf32> to vector<16x128xf32>
    %89 = arith.mulf %87, %88 : vector<16x128xf32>
    %90 = arith.addf %79, %89 : vector<16x128xf32>
    %c8_i32 = arith.constant 8 : i32
    %91 = vector.broadcast %c8_i32 : i32 to vector<16x1xi32>
    %92 = arith.cmpi eq, %0, %91 : vector<16x1xi32>
    %93 = arith.extui %92 : vector<16x1xi1> to vector<16x1xi32>
    %94 = arith.sitofp %93 : vector<16x1xi32> to vector<16x1xf32>
    %95 = vector.extract_strided_slice %1 {offsets = [8, 0], sizes = [1, 128], strides = [1, 1]} : vector<16x128xf32> to vector<1x128xf32>
    %96 = vector.shape_cast %95 : vector<1x128xf32> to vector<128xf32>
    %97 = vector.shape_cast %96 : vector<128xf32> to vector<1x128xf32>
    %98 = vector.broadcast %94 : vector<16x1xf32> to vector<16x128xf32>
    %99 = vector.broadcast %97 : vector<1x128xf32> to vector<16x128xf32>
    %100 = arith.mulf %98, %99 : vector<16x128xf32>
    %101 = arith.addf %90, %100 : vector<16x128xf32>
    %c9_i32 = arith.constant 9 : i32
    %102 = vector.broadcast %c9_i32 : i32 to vector<16x1xi32>
    %103 = arith.cmpi eq, %0, %102 : vector<16x1xi32>
    %104 = arith.extui %103 : vector<16x1xi1> to vector<16x1xi32>
    %105 = arith.sitofp %104 : vector<16x1xi32> to vector<16x1xf32>
    %106 = vector.extract_strided_slice %1 {offsets = [9, 0], sizes = [1, 128], strides = [1, 1]} : vector<16x128xf32> to vector<1x128xf32>
    %107 = vector.shape_cast %106 : vector<1x128xf32> to vector<128xf32>
    %108 = vector.shape_cast %107 : vector<128xf32> to vector<1x128xf32>
    %109 = vector.broadcast %105 : vector<16x1xf32> to vector<16x128xf32>
    %110 = vector.broadcast %108 : vector<1x128xf32> to vector<16x128xf32>
    %111 = arith.mulf %109, %110 : vector<16x128xf32>
    %112 = arith.addf %101, %111 : vector<16x128xf32>
    %c10_i32 = arith.constant 10 : i32
    %113 = vector.broadcast %c10_i32 : i32 to vector<16x1xi32>
    %114 = arith.cmpi eq, %0, %113 : vector<16x1xi32>
    %115 = arith.extui %114 : vector<16x1xi1> to vector<16x1xi32>
    %116 = arith.sitofp %115 : vector<16x1xi32> to vector<16x1xf32>
    %117 = vector.extract_strided_slice %1 {offsets = [10, 0], sizes = [1, 128], strides = [1, 1]} : vector<16x128xf32> to vector<1x128xf32>
    %118 = vector.shape_cast %117 : vector<1x128xf32> to vector<128xf32>
    %119 = vector.shape_cast %118 : vector<128xf32> to vector<1x128xf32>
    %120 = vector.broadcast %116 : vector<16x1xf32> to vector<16x128xf32>
    %121 = vector.broadcast %119 : vector<1x128xf32> to vector<16x128xf32>
    %122 = arith.mulf %120, %121 : vector<16x128xf32>
    %123 = arith.addf %112, %122 : vector<16x128xf32>
    %c11_i32 = arith.constant 11 : i32
    %124 = vector.broadcast %c11_i32 : i32 to vector<16x1xi32>
    %125 = arith.cmpi eq, %0, %124 : vector<16x1xi32>
    %126 = arith.extui %125 : vector<16x1xi1> to vector<16x1xi32>
    %127 = arith.sitofp %126 : vector<16x1xi32> to vector<16x1xf32>
    %128 = vector.extract_strided_slice %1 {offsets = [11, 0], sizes = [1, 128], strides = [1, 1]} : vector<16x128xf32> to vector<1x128xf32>
    %129 = vector.shape_cast %128 : vector<1x128xf32> to vector<128xf32>
    %130 = vector.shape_cast %129 : vector<128xf32> to vector<1x128xf32>
    %131 = vector.broadcast %127 : vector<16x1xf32> to vector<16x128xf32>
    %132 = vector.broadcast %130 : vector<1x128xf32> to vector<16x128xf32>
    %133 = arith.mulf %131, %132 : vector<16x128xf32>
    %134 = arith.addf %123, %133 : vector<16x128xf32>
    %c12_i32 = arith.constant 12 : i32
    %135 = vector.broadcast %c12_i32 : i32 to vector<16x1xi32>
    %136 = arith.cmpi eq, %0, %135 : vector<16x1xi32>
    %137 = arith.extui %136 : vector<16x1xi1> to vector<16x1xi32>
    %138 = arith.sitofp %137 : vector<16x1xi32> to vector<16x1xf32>
    %139 = vector.extract_strided_slice %1 {offsets = [12, 0], sizes = [1, 128], strides = [1, 1]} : vector<16x128xf32> to vector<1x128xf32>
    %140 = vector.shape_cast %139 : vector<1x128xf32> to vector<128xf32>
    %141 = vector.shape_cast %140 : vector<128xf32> to vector<1x128xf32>
    %142 = vector.broadcast %138 : vector<16x1xf32> to vector<16x128xf32>
    %143 = vector.broadcast %141 : vector<1x128xf32> to vector<16x128xf32>
    %144 = arith.mulf %142, %143 : vector<16x128xf32>
    %145 = arith.addf %134, %144 : vector<16x128xf32>
    %c13_i32 = arith.constant 13 : i32
    %146 = vector.broadcast %c13_i32 : i32 to vector<16x1xi32>
    %147 = arith.cmpi eq, %0, %146 : vector<16x1xi32>
    %148 = arith.extui %147 : vector<16x1xi1> to vector<16x1xi32>
    %149 = arith.sitofp %148 : vector<16x1xi32> to vector<16x1xf32>
    %150 = vector.extract_strided_slice %1 {offsets = [13, 0], sizes = [1, 128], strides = [1, 1]} : vector<16x128xf32> to vector<1x128xf32>
    %151 = vector.shape_cast %150 : vector<1x128xf32> to vector<128xf32>
    %152 = vector.shape_cast %151 : vector<128xf32> to vector<1x128xf32>
    %153 = vector.broadcast %149 : vector<16x1xf32> to vector<16x128xf32>
    %154 = vector.broadcast %152 : vector<1x128xf32> to vector<16x128xf32>
    %155 = arith.mulf %153, %154 : vector<16x128xf32>
    %156 = arith.addf %145, %155 : vector<16x128xf32>
    %c14_i32 = arith.constant 14 : i32
    %157 = vector.broadcast %c14_i32 : i32 to vector<16x1xi32>
    %158 = arith.cmpi eq, %0, %157 : vector<16x1xi32>
    %159 = arith.extui %158 : vector<16x1xi1> to vector<16x1xi32>
    %160 = arith.sitofp %159 : vector<16x1xi32> to vector<16x1xf32>
    %161 = vector.extract_strided_slice %1 {offsets = [14, 0], sizes = [1, 128], strides = [1, 1]} : vector<16x128xf32> to vector<1x128xf32>
    %162 = vector.shape_cast %161 : vector<1x128xf32> to vector<128xf32>
    %163 = vector.shape_cast %162 : vector<128xf32> to vector<1x128xf32>
    %164 = vector.broadcast %160 : vector<16x1xf32> to vector<16x128xf32>
    %165 = vector.broadcast %163 : vector<1x128xf32> to vector<16x128xf32>
    %166 = arith.mulf %164, %165 : vector<16x128xf32>
    %167 = arith.addf %156, %166 : vector<16x128xf32>
    %c15_i32 = arith.constant 15 : i32
    %168 = vector.broadcast %c15_i32 : i32 to vector<16x1xi32>
    %169 = arith.cmpi eq, %0, %168 : vector<16x1xi32>
    %170 = arith.extui %169 : vector<16x1xi1> to vector<16x1xi32>
    %171 = arith.sitofp %170 : vector<16x1xi32> to vector<16x1xf32>
    %172 = vector.extract_strided_slice %1 {offsets = [15, 0], sizes = [1, 128], strides = [1, 1]} : vector<16x128xf32> to vector<1x128xf32>
    %173 = vector.shape_cast %172 : vector<1x128xf32> to vector<128xf32>
    %174 = vector.shape_cast %173 : vector<128xf32> to vector<1x128xf32>
    %175 = vector.broadcast %171 : vector<16x1xf32> to vector<16x128xf32>
    %176 = vector.broadcast %174 : vector<1x128xf32> to vector<16x128xf32>
    %177 = arith.mulf %175, %176 : vector<16x128xf32>
    %178 = arith.addf %167, %177 : vector<16x128xf32>
    %c0_3 = arith.constant 0 : index
    %c0_4 = arith.constant 0 : index
    %179 = vector.load %arg3[%c0_3, %c0_4] : memref<16x128xf32, #tpu.memory_space<vmem>>, vector<16x128xf32>
    tpu.vector_store %arg3[%c0_3, %c0_4], %178 {strides = array<i32>} : memref<16x128xf32, #tpu.memory_space<vmem>>, vector<16x128xf32>,
    return
  }
  func.func @transform_0(%arg0: i32) -> (i32, i32) {
    %c0_i32 = arith.constant 0 : i32
    %c0_i32_0 = arith.constant 0 : i32
    return %arg0, %c0_i32 : i32, i32
  }
  func.func @transform_1(%arg0: i32) -> (i32, i32) {
    %c0_i32 = arith.constant 0 : i32
    %c0_i32_0 = arith.constant 0 : i32
    %c0_i32_1 = arith.constant 0 : i32
    return %c0_i32, %c0_i32_0 : i32, i32
  }
  func.func @transform_2(%arg0: i32) -> (i32, i32) {
    %c0_i32 = arith.constant 0 : i32
    %c0_i32_0 = arith.constant 0 : i32
    return %arg0, %c0_i32 : i32, i32
  }
}

</mosaic_0001>

<bundles_post_ra>
// kernel: tpu_custom_call.1
= control target key start
LH: loop header
LB: loop body
LE: loop exit
PB: predicated region body
PF: predicated region fallthrough
CT: control target
= control target key end

     0   :  { %s641_s0 = inlined_call_operand.vmem [shape: s32[16,1], index: 0, kind: input, shape index: {}]   ;;  %s642_s1 = inlined_call_operand.vmem [shape: f32[16,128], index: 1, kind: input, shape index: {}]   ;;  %s643_s2 = inlined_call_operand.hbm [shape: f32[16,128], index: 2, kind: output, shape index: {}]  }
   0x1   :  { %v541_v0 = vld [vmem:[%s641_s0] sm:$0xff]  ;;  %v546_v1 = vld [vmem:[%s641_s0 + $0x8] sm:$0xff] }
   0x2   :  { %7 = vsyncpa [#allocation3], 0  ;;  %v518_v2 = vmov 0   ;;  %vm100_vm0 = vcmp.eq.s32.totalorder %v541_v0, 4  ;;  %vm101_vm1 = vcmp.eq.s32.totalorder %v546_v1, 4  ;;  %vm58_vm2 = vcmp.eq.s32.totalorder %v541_v0, 2 }
   0x3   :  { %431 = vset.pattern.permute.xlu2 %v518_v2  ;;  %420 = vset.pattern.permute.xlu1 %v518_v2  ;;  %vm59_vm3 = vcmp.eq.s32.totalorder %v546_v1, 2  ;;  %v519_v3 = vmov 0.0   ;;  %vm16_vm4 = vcmp.eq.s32.totalorder %v541_v0, 0  ;;  %vm17_vm5 = vcmp.eq.s32.totalorder %v546_v1, 0  ;;  %v615_v56 = vld [vmem:[%s642_s1] sm:$0xff]  ;;  %s360_s19 = sshll.u32 %s643_s2, 4  ;;  %s361_s19 = int_to_ptr.hbm [resolvable:$true] %s360_s19 }
   0x4   :  { %409 = vset.pattern.permute.xlu0 %v518_v2  ;;  %v380_v4 = vsel %vm100_vm0, 1.0, %v519_v3  ;;  %v381_v5 = vsel %vm101_vm1, 1.0, %v519_v3  ;;  %v376_v6 = vsel %vm58_vm2, 1.0, %v519_v3  ;;  %v377_v7 = vsel %vm59_vm3, 1.0, %v519_v3  ;;  %s521_s20 = smov 128   ;;  %s522_s21 = smov 8  }
   0x5   :  { %v432_v8 = vpack.i.bf16 %v381_v5, %v380_v4  ;;  %v421_v9 = vpack.i.bf16 %v377_v7, %v376_v6  ;;  %v372_v10 = vsel %vm16_vm4, 1.0, %v519_v3  ;;  %v373_v11 = vsel %vm17_vm5, 1.0, %v519_v3 }
   0x6   :  { %vm121_vm6 = vcmp.eq.s32.totalorder %v541_v0, 5  ;;  %vm122_vm7 = vcmp.eq.s32.totalorder %v546_v1, 5  ;;  %v410_v12 = vpack.i.bf16 %v373_v11, %v372_v10  ;;  %vm79_vm8 = vcmp.eq.s32.totalorder %v541_v0, 3 }
   0x7   :  { %433 = vperm.xlu2 %431, %v432_v8   ;;  %422 = vperm.xlu1 %420, %v421_v9   ;;  %v382_v13 = vsel %vm121_vm6, 1.0, %v519_v3  ;;  %v383_v14 = vsel %vm122_vm7, 1.0, %v519_v3  ;;  %vm80_vm9 = vcmp.eq.s32.totalorder %v546_v1, 3  ;;  %v378_v15 = vsel %vm79_vm8, 1.0, %v519_v3 }
   0x8   :  { %vm37_vm10 = vcmp.eq.s32.totalorder %v541_v0, 1  ;;  %411 = vperm.xlu0 %409, %v410_v12   ;;  %v379_v16 = vsel %vm80_vm9, 1.0, %v519_v3  ;;  %vm38_vm11 = vcmp.eq.s32.totalorder %v546_v1, 1  ;;  %v437_v19 = vpack.i.bf16 %v383_v14, %v382_v13 }
   0x9   :  { %v374_v17 = vsel %vm37_vm10, 1.0, %v519_v3  ;;  %v375_v18 = vsel %vm38_vm11, 1.0, %v519_v3  ;;  %v426_v20 = vpack.i.bf16 %v379_v16, %v378_v15  ;;  %vm184_vm12 = vcmp.eq.s32.totalorder %v541_v0, 8  ;;  %v625_v15 = vld [vmem:[%s642_s1 + $0x8] sm:$0xff]  ;;  %s520_s1 = smov [#allocation2]  }
   0xa   :  { %v415_v21 = vpack.i.bf16 %v375_v18, %v374_v17  ;;  %vm185_vm13 = vcmp.eq.s32.totalorder %v546_v1, 8  ;;  %vm163_vm14 = vcmp.eq.s32.totalorder %v541_v0, 7  ;;  %vm164_vm15 = vcmp.eq.s32.totalorder %v546_v1, 7  ;;  %s358_s16 = sshll.u32 %s520_s1, 4  ;;  %s359_s16 = int_to_ptr.vmem [resolvable:$true] %s358_s16 }
   0xb   :  { %vm142_vm0 = vcmp.eq.s32.totalorder %v541_v0, 6  ;;  %vm143_vm1 = vcmp.eq.s32.totalorder %v546_v1, 6  ;;  %v388_v22 = vsel %vm184_vm12, 1.0, %v519_v3  ;;  %v389_v23 = vsel %vm185_vm13, 1.0, %v519_v3 }
   0xc   :  { %v386_v24 = vsel %vm163_vm14, 1.0, %v519_v3  ;;  %v387_v25 = vsel %vm164_vm15, 1.0, %v519_v3  ;;  %v384_v26 = vsel %vm142_vm0, 1.0, %v519_v3  ;;  %v385_v27 = vsel %vm143_vm1, 1.0, %v519_v3 }
   0xd   :  { %v452_v28 = vpack.i.bf16 %v389_v23, %v388_v22  ;;  %v447_v29 = vpack.i.bf16 %v387_v25, %v386_v24  ;;  %vm247_vm2 = vcmp.eq.s32.totalorder %v541_v0, 11  ;;  %v442_v30 = vpack.i.bf16 %v385_v27, %v384_v26 }
   0xe   :  { %vm248_vm3 = vcmp.eq.s32.totalorder %v546_v1, 11  ;;  %vm226_vm4 = vcmp.eq.s32.totalorder %v541_v0, 10  ;;  %vm227_vm5 = vcmp.eq.s32.totalorder %v546_v1, 10  ;;  %vm205_vm6 = vcmp.eq.s32.totalorder %v541_v0, 9 }
   0xf   :  { %438 = vperm.xlu2 %431, %v437_v19   ;;  %427 = vperm.xlu1 %420, %v426_v20   ;;  %vm206_vm7 = vcmp.eq.s32.totalorder %v546_v1, 9  ;;  %v394_v31 = vsel %vm247_vm2, 1.0, %v519_v3  ;;  %v395_v32 = vsel %vm248_vm3, 1.0, %v519_v3  ;;  %v392_v33 = vsel %vm226_vm4, 1.0, %v519_v3 }
  0x10   :  { %416 = vperm.xlu0 %409, %v415_v21   ;;  %v393_v34 = vsel %vm227_vm5, 1.0, %v519_v3  ;;  %v390_v35 = vsel %vm205_vm6, 1.0, %v519_v3  ;;  %v391_v36 = vsel %vm206_vm7, 1.0, %v519_v3  ;;  %v467_v37 = vpack.i.bf16 %v395_v32, %v394_v31 }
  0x11   :  { %v462_v38 = vpack.i.bf16 %v393_v34, %v392_v33  ;;  %vm310_vm8 = vcmp.eq.s32.totalorder %v541_v0, 14  ;;  %v457_v39 = vpack.i.bf16 %v391_v36, %v390_v35  ;;  %vm311_vm9 = vcmp.eq.s32.totalorder %v546_v1, 14 }
  0x12   :  { %vm289_vm10 = vcmp.eq.s32.totalorder %v541_v0, 13  ;;  %vm290_vm11 = vcmp.eq.s32.totalorder %v546_v1, 13  ;;  %vm268_vm12 = vcmp.eq.s32.totalorder %v541_v0, 12  ;;  %vm269_vm13 = vcmp.eq.s32.totalorder %v546_v1, 12 }
  0x13   :  { %v400_v40 = vsel %vm310_vm8, 1.0, %v519_v3  ;;  %v401_v41 = vsel %vm311_vm9, 1.0, %v519_v3  ;;  %v398_v42 = vsel %vm289_vm10, 1.0, %v519_v3  ;;  %v399_v43 = vsel %vm290_vm11, 1.0, %v519_v3 }
  0x14   :  { %v396_v44 = vsel %vm268_vm12, 1.0, %v519_v3  ;;  %v397_v45 = vsel %vm269_vm13, 1.0, %v519_v3  ;;  %v482_v46 = vpack.i.bf16 %v401_v41, %v400_v40  ;;  %v477_v47 = vpack.i.bf16 %v399_v43, %v398_v42 }
  0x15   :  { %v472_v48 = vpack.i.bf16 %v397_v45, %v396_v44  ;;  %vm331_vm14 = vcmp.eq.s32.totalorder %v541_v0, 15  ;;  %vm332_vm15 = vcmp.eq.s32.totalorder %v546_v1, 15  ;;  %v32_v58 = vperm.slane %v615_v56, 0 }
  0x16   :  { %v402_v49 = vsel %vm331_vm14, 1.0, %v519_v3  ;;  %v403_v50 = vsel %vm332_vm15, 1.0, %v519_v3  ;;  %v53_v61 = vperm.slane %v615_v56, 1  ;;  %v74_v63 = vperm.slane %v615_v56, 2 }
  0x17   :  { %453 = vperm.xlu2 %431, %v452_v28   ;;  %448 = vperm.xlu1 %420, %v447_v29   ;;  %v487_v51 = vpack.i.bf16 %v403_v50, %v402_v49  ;;  %v95_v6 = vperm.slane %v615_v56, 3  ;;  %v116_v11 = vperm.slane %v615_v56, 4  ;;  %v137_v21 = vperm.slane %v615_v56, 5 }
  0x18   :  { %443 = vperm.xlu0 %409, %v442_v30   ;;  %v200_v31 = vperm.slane %v625_v15, 0  ;;  %v158_v32 = vperm.slane %v615_v56, 6  ;;  %v179_v40 = vperm.slane %v615_v56, 7 }
  0x1f   :  { %468 = vperm.xlu2 %431, %v467_v37   ;;  %463 = vperm.xlu1 %420, %v462_v38  }
  0x20   :  { %458 = vperm.xlu0 %409, %v457_v39  }
  0x27   :  { %483 = vperm.xlu2 %431, %v482_v46   ;;  %478 = vperm.xlu1 %420, %v477_v47  }
  0x28   :  { %473 = vperm.xlu0 %409, %v472_v48  }
  0x30   :  { %488 = vperm.xlu0 %409, %v487_v51  }
  0x61   :  { %v434_v52 = vpop.permute.xlu2 %433 }
  0x62   :  { %v436_v12 = vunpack.i.h.bf16 %v434_v52  ;;  %v435_v13 = vunpack.i.l.bf16 %v434_v52 }
  0x64   :  { %v118_v29 = vmul.f32 %v436_v12, %v116_v11  ;;  %v117_v30 = vmul.f32 %v435_v13, %v116_v11 }
  0x69   :  { %v439_v55 = vpop.permute.xlu2 %438 }
  0x6a   :  { %v441_v22 = vunpack.i.h.bf16 %v439_v55  ;;  %v440_v23 = vunpack.i.l.bf16 %v439_v55 }
  0x6c   :  { %v139_v37 = vmul.f32 %v441_v22, %v137_v21  ;;  %v138_v38 = vmul.f32 %v440_v23, %v137_v21 }
  0x71   :  { %v454_v14 = vpop.permute.xlu2 %453 }
  0x72   :  { %v456_v39 = vunpack.i.h.bf16 %v454_v14  ;;  %v455_v45 = vunpack.i.l.bf16 %v454_v14 }
  0x74   :  { %v202_v51 = vmul.f32 %v456_v39, %v200_v31  ;;  %v201_v56 = vmul.f32 %v455_v45, %v200_v31 }
  0x79   :  { %v423_v53 = vpop.permute.xlu1 %422  ;;  %v469_v52 = vpop.permute.xlu2 %468 }
  0x7a   :  { %v412_v54 = vpop.permute.xlu0 %411  ;;  %v425_v0 = vunpack.i.h.bf16 %v423_v53  ;;  %v424_v1 = vunpack.i.l.bf16 %v423_v53  ;;  %v221_v53 = vperm.slane %v625_v15, 1 }
  0x7b   :  { %v414_v59 = vunpack.i.h.bf16 %v412_v54  ;;  %v413_v60 = vunpack.i.l.bf16 %v412_v54 }
  0x7c   :  { %v76_v16 = vmul.f32 %v425_v0, %v74_v63  ;;  %v75_v17 = vmul.f32 %v424_v1, %v74_v63 }
  0x7d   :  { %v34_v4 = vmul.f32 %v414_v59, %v32_v58  ;;  %v33_v5 = vmul.f32 %v413_v60, %v32_v58  ;;  %v242_v60 = vperm.slane %v625_v15, 2 }
  0x81   :  { %v428_v57 = vpop.permute.xlu1 %427  ;;  %v484_v23 = vpop.permute.xlu2 %483 }
  0x82   :  { %v417_v62 = vpop.permute.xlu0 %416  ;;  %v430_v7 = vunpack.i.h.bf16 %v428_v57  ;;  %v429_v8 = vunpack.i.l.bf16 %v428_v57 }
  0x83   :  { %v419_v2 = vunpack.i.h.bf16 %v417_v62  ;;  %v418_v3 = vunpack.i.l.bf16 %v417_v62 }
  0x84   :  { %v97_v24 = vmul.f32 %v430_v7, %v95_v6  ;;  %v96_v25 = vmul.f32 %v429_v8, %v95_v6  ;;  %v471_v6 = vunpack.i.h.bf16 %v469_v52  ;;  %v470_v7 = vunpack.i.l.bf16 %v469_v52 }
  0x85   :  { %v55_v9 = vmul.f32 %v419_v2, %v53_v61  ;;  %v54_v10 = vmul.f32 %v418_v3, %v53_v61  ;;  %v263_v3 = vperm.slane %v625_v15, 3 }
  0x87   :  { %v56_v18 = vadd.f32 %v54_v10, %v33_v5  ;;  %v57_v19 = vadd.f32 %v55_v9, %v34_v4 }
  0x89   :  { %v449_v20 = vpop.permute.xlu1 %448  ;;  %v77_v26 = vadd.f32 %v75_v17, %v56_v18  ;;  %v78_v27 = vadd.f32 %v76_v16, %v57_v19  ;;  %v305_v16 = vperm.slane %v625_v15, 5  ;;  %v284_v17 = vperm.slane %v625_v15, 4 }
  0x8a   :  { %v444_v28 = vpop.permute.xlu0 %443  ;;  %v451_v41 = vunpack.i.h.bf16 %v449_v20  ;;  %v450_v42 = vunpack.i.l.bf16 %v449_v20  ;;  %v265_v18 = vmul.f32 %v471_v6, %v263_v3  ;;  %v264_v19 = vmul.f32 %v470_v7, %v263_v3 }
  0x8b   :  { %v98_v33 = vadd.f32 %v96_v25, %v77_v26  ;;  %v99_v34 = vadd.f32 %v97_v24, %v78_v27  ;;  %v446_v35 = vunpack.i.h.bf16 %v444_v28  ;;  %v445_v36 = vunpack.i.l.bf16 %v444_v28 }
  0x8c   :  { %v181_v54 = vmul.f32 %v451_v41, %v179_v40  ;;  %v180_v55 = vmul.f32 %v450_v42, %v179_v40  ;;  %v347_v41 = vperm.slane %v625_v15, 7 }
  0x8d   :  { %v119_v43 = vadd.f32 %v117_v30, %v98_v33  ;;  %v120_v44 = vadd.f32 %v118_v29, %v99_v34  ;;  %v160_v46 = vmul.f32 %v446_v35, %v158_v32  ;;  %v159_v49 = vmul.f32 %v445_v36, %v158_v32 }
  0x8e   :  { %v326_v32 = vperm.slane %v625_v15, 6  ;;  %v486_v33 = vunpack.i.h.bf16 %v484_v23  ;;  %v485_v34 = vunpack.i.l.bf16 %v484_v23 }
  0x8f   :  { %v140_v47 = vadd.f32 %v138_v38, %v119_v43  ;;  %v141_v48 = vadd.f32 %v139_v37, %v120_v44 }
  0x90   :  { %v328_v43 = vmul.f32 %v486_v33, %v326_v32  ;;  %v327_v44 = vmul.f32 %v485_v34, %v326_v32 }
  0x91   :  { %v464_v50 = vpop.permute.xlu1 %463  ;;  %v161_v57 = vadd.f32 %v159_v49, %v140_v47  ;;  %v162_v58 = vadd.f32 %v160_v46, %v141_v48 }
  0x92   :  { %v459_v59 = vpop.permute.xlu0 %458  ;;  %v466_v1 = vunpack.i.h.bf16 %v464_v50  ;;  %v465_v2 = vunpack.i.l.bf16 %v464_v50 }
  0x93   :  { %v461_v61 = vunpack.i.h.bf16 %v459_v59  ;;  %v460_v62 = vunpack.i.l.bf16 %v459_v59  ;;  %v182_v63 = vadd.f32 %v180_v55, %v161_v57  ;;  %v183_v0 = vadd.f32 %v181_v54, %v162_v58 }
  0x94   :  { %v244_v10 = vmul.f32 %v466_v1, %v242_v60  ;;  %v243_v11 = vmul.f32 %v465_v2, %v242_v60 }
  0x95   :  { %v223_v4 = vmul.f32 %v461_v61, %v221_v53  ;;  %v222_v5 = vmul.f32 %v460_v62, %v221_v53  ;;  %v203_v8 = vadd.f32 %v201_v56, %v182_v63  ;;  %v204_v9 = vadd.f32 %v202_v51, %v183_v0 }
  0x97   :  { %v224_v12 = vadd.f32 %v222_v5, %v203_v8  ;;  %v225_v13 = vadd.f32 %v223_v4, %v204_v9 }
  0x99   :  { %v479_v14 = vpop.permute.xlu1 %478  ;;  %v245_v20 = vadd.f32 %v243_v11, %v224_v12  ;;  %v246_v21 = vadd.f32 %v244_v10, %v225_v13 }
  0x9a   :  { %v474_v22 = vpop.permute.xlu0 %473  ;;  %v481_v24 = vunpack.i.h.bf16 %v479_v14  ;;  %v480_v25 = vunpack.i.l.bf16 %v479_v14 }
  0x9b   :  { %v476_v26 = vunpack.i.h.bf16 %v474_v22  ;;  %v475_v27 = vunpack.i.l.bf16 %v474_v22  ;;  %v266_v29 = vadd.f32 %v264_v19, %v245_v20  ;;  %v267_v30 = vadd.f32 %v265_v18, %v246_v21 }
  0x9c   :  { %v307_v35 = vmul.f32 %v481_v24, %v305_v16  ;;  %v306_v36 = vmul.f32 %v480_v25, %v305_v16 }
  0x9d   :  { %v286_v28 = vmul.f32 %v476_v26, %v284_v17  ;;  %v285_v31 = vmul.f32 %v475_v27, %v284_v17 }
  0x9f   :  { %v287_v37 = vadd.f32 %v285_v31, %v266_v29  ;;  %v288_v38 = vadd.f32 %v286_v28, %v267_v30 }
  0xa1   :  { %v308_v39 = vadd.f32 %v306_v36, %v287_v37  ;;  %v309_v40 = vadd.f32 %v307_v35, %v288_v38 }
  0xa2   :  { %v489_v42 = vpop.permute.xlu0 %488 }
  0xa3   :  { %v491_v45 = vunpack.i.h.bf16 %v489_v42  ;;  %v490_v46 = vunpack.i.l.bf16 %v489_v42  ;;  %v329_v48 = vadd.f32 %v327_v44, %v308_v39  ;;  %v330_v49 = vadd.f32 %v328_v43, %v309_v40 }
  0xa5   :  { %v349_v47 = vmul.f32 %v491_v45, %v347_v41  ;;  %v348_v50 = vmul.f32 %v490_v46, %v347_v41 }
  0xa7   :  { %v350_v51 = vadd.f32 %v348_v50, %v329_v48  ;;  %v351_v52 = vadd.f32 %v349_v47, %v330_v49 }
  0xa9   :  { %352 = vst [vmem:[#allocation2] sm:$0xff] %v350_v51 }
  0xaa   :  { %353 = vst [vmem:[#allocation2 + $0x8] sm:$0xff] %v351_v52 }
  0xab   :  { %366 = dma.vmem_to_hbm [thread:$0]  %s359_s16, 256, %s361_s19, [#allocation3], %s521_s20, %s521_s20, %s522_s21  }
  0xac   :  { %516 = dma.done.wait [#allocation3], 256  }
  0xad   :  { %517 = vsyncadd [#allocation3], 4294967040 }
  0xae   :  { %371 = vsyncpa [#allocation3], 1 }

</bundles_post_ra>
